<compile_context>
chip_gen: v7x
topology: tpu7x:2x2x1
jax: 0.10.0
libtpu: 0.0.40
codegen_flags: <defaults>
</compile_context>

<pallas_src>
import functools

import jax
import jax.numpy as jnp
import numpy as np
from jax.experimental import pallas as pl
from jax.experimental.pallas import tpu as pltpu


def mlp_kernel(xT_ref, w0_ref, b0_ref, w1_ref, b1_ref, w2_ref, b2_ref,
               wo_ref, bo_ref, out_ref):
    # xT: (D, TN) bf16; weights are (out_dim, in_dim) bf16; biases (out_dim, 1) f32.
    x = xT_ref[...]

    # fc_0 + relu
    h = jnp.dot(w0_ref[...], x, preferred_element_type=jnp.float32)
    h = jnp.maximum(h + b0_ref[...], 0.0)

    # drop_1 (p=0.0 -> identity) + fc_1 + relu
    h = jnp.dot(w1_ref[...], h.astype(jnp.bfloat16),
                preferred_element_type=jnp.float32)
    h = jnp.maximum(h + b1_ref[...], 0.0)

    # drop_2 (p=0.0 -> identity) + fc_2 + relu
    h = jnp.dot(w2_ref[...], h.astype(jnp.bfloat16),
                preferred_element_type=jnp.float32)
    h = jnp.maximum(h + b2_ref[...], 0.0)

    # fc_out
    logits = jnp.dot(wo_ref[...], h.astype(jnp.bfloat16),
                     preferred_element_type=jnp.float32) + bo_ref[...]

    # softmax over the feature axis (axis 0 here == PyTorch dim=1), all in f32.
    m = jnp.max(logits, axis=0, keepdims=True)
    e = jnp.exp(logits - m)
    denom = jnp.sum(e, axis=0, keepdims=True)
    out_ref[...] = (e * pl.reciprocal(denom, approx=True)).astype(out_ref.dtype)


def _round_up(n, m):
    return ((n + m - 1) // m) * m


def _resident(shape):
    # Full-array block, constant block index -> stays pinned in VMEM across
    # every grid step.  `shape` is bound per call (no late-binding bug).
    return pl.BlockSpec(shape, lambda i: (0,) * len(shape))


def mlp_forward(x, params, *, block_n=512):
    """x: (N, d_feat) f32.  Returns softmax(mlp(x)) of shape (N, output_dim)."""
    w0, b0, w1, b1, w2, b2, wo, bo = params
    N, D = x.shape
    H = w0.shape[0]
    OUT = wo.shape[0]

    # Batch tile: multiple of 128 (lane-dense), clipped to the padded batch.
    block_n = _round_up(block_n, 128)
    TN = min(block_n, _round_up(N, 128))
    N_pad = _round_up(N, TN)
    if N_pad != N:
        x = jnp.pad(x, ((0, N_pad - N), (0, 0)))

    # Lane-dense layout: batch on lanes, features on sublanes; bf16 MXU inputs.
    xT = jnp.transpose(x).astype(jnp.bfloat16)                 # (D, N_pad)
    w0b, w1b, w2b, wob = (w.astype(jnp.bfloat16) for w in (w0, w1, w2, wo))

    grid = (N_pad // TN,)

    flops = 2 * N_pad * (D * H + H * H + H * H + H * OUT)
    transcendentals = N_pad * (OUT + 1)                        # exp + reciprocal
    bytes_accessed = (N_pad * D * 2                            # xT (bf16)
                      + N_pad * OUT * 4                        # output (f32)
                      + (D * H + 2 * H * H + H * OUT) * 2      # bf16 weights
                      + (3 * H + OUT) * 4)                     # f32 biases
    cost = pl.CostEstimate(flops=flops, transcendentals=transcendentals,
                           bytes_accessed=bytes_accessed)

    outT = pl.pallas_call(
        mlp_kernel,
        out_shape=jax.ShapeDtypeStruct((OUT, N_pad), jnp.float32),
        grid=grid,
        in_specs=[
            pl.BlockSpec((D, TN), lambda i: (0, i)),           # x: tiled over batch
            _resident(w0b.shape), _resident(b0.shape),
            _resident(w1b.shape), _resident(b1.shape),
            _resident(w2b.shape), _resident(b2.shape),
            _resident(wob.shape), _resident(bo.shape),
        ],
        out_specs=pl.BlockSpec((OUT, TN), lambda i: (0, i)),
        compiler_params=pltpu.CompilerParams(
            dimension_semantics=("parallel",)),
        cost_estimate=cost,
    )(xT, w0b, b0, w1b, b1, w2b, b2, wob, bo)

    return jnp.transpose(outT)[:N]                             # (N, OUT)


def init_params(key, d_feat, hidden, output_dim):
    """PyTorch-style params: weights (out_features, in_features), biases (out, 1)."""
    ks = jax.random.split(key, 8)

    def lin(kw, kb, fan_in, fan_out):
        bound = 1.0 / np.sqrt(fan_in)
        w = jax.random.uniform(kw, (fan_out, fan_in), jnp.float32, -bound, bound)
        b = jax.random.uniform(kb, (fan_out, 1), jnp.float32, -bound, bound)
        return w, b

    w0, b0 = lin(ks[0], ks[1], d_feat, hidden)
    w1, b1 = lin(ks[2], ks[3], hidden, hidden)
    w2, b2 = lin(ks[4], ks[5], hidden, hidden)
    wo, bo = lin(ks[6], ks[7], hidden, output_dim)
    return (w0, b0, w1, b1, w2, b2, wo, bo)


def mlp_reference(x, params):
    """Pure-JAX reference with the same precision recipe as the kernel
    (bf16 matmul inputs, f32 accumulation); semantically the PyTorch forward."""
    w0, b0, w1, b1, w2, b2, wo, bo = params

    def lin(h, w, b):
        return jnp.dot(h.astype(jnp.bfloat16), w.T.astype(jnp.bfloat16),
                       preferred_element_type=jnp.float32) + b[:, 0]

    h = jnp.maximum(lin(x, w0, b0), 0.0)
    h = jnp.maximum(lin(h, w1, b1), 0.0)
    h = jnp.maximum(lin(h, w2, b2), 0.0)
    logits = lin(h, wo, bo)
    return jax.nn.softmax(logits, axis=1)


if __name__ == "__main__":
    # Small, module-consistent shapes; N=200 exercises the pad+slice path and
    # block_n=128 exercises a multi-step grid with resident weights.
    N, D_FEAT, HIDDEN, OUT = 200, 16, 32, 4
    key = jax.random.PRNGKey(0)
    kx, kp = jax.random.split(key)
    x = jax.random.normal(kx, (N, D_FEAT), jnp.float32)
    params = init_params(kp, D_FEAT, HIDDEN, OUT)

    out = mlp_forward(x, params, block_n=128)
    out = jax.block_until_ready(out)

    ref = mlp_reference(x, params)
    np.testing.assert_allclose(np.asarray(out), np.asarray(ref),
                               rtol=1e-2, atol=1e-2)
    print("KERNEL_OK")
</pallas_src>

<mosaic_0001>
module attributes {stable_mosaic.version = 11 : i64} {
  func.func @mlp_kernel(%arg0: i32, %arg1: memref<16x128xbf16, #tpu.memory_space<vmem>>, %arg2: memref<32x16xbf16, #tpu.memory_space<vmem>>, %arg3: memref<32x1xf32, #tpu.memory_space<vmem>>, %arg4: memref<32x32xbf16, #tpu.memory_space<vmem>>, %arg5: memref<32x1xf32, #tpu.memory_space<vmem>>, %arg6: memref<32x32xbf16, #tpu.memory_space<vmem>>, %arg7: memref<32x1xf32, #tpu.memory_space<vmem>>, %arg8: memref<4x32xbf16, #tpu.memory_space<vmem>>, %arg9: memref<4x1xf32, #tpu.memory_space<vmem>>, %arg10: memref<4x128xf32, #tpu.memory_space<vmem>>) attributes {dimension_semantics = [#tpu.dimension_semantics<parallel>], iteration_bounds = array<i64: 2>, scalar_prefetch = 0 : i64, scratch_operands = 0 : i64, tpu.core_type = #tpu.core_type<tc>, window_params = [{transform_indices = @transform_0, window_bounds = array<i64: 16, 128>}, {pipeline_mode = #tpu.pipeline_mode<synchronous>, transform_indices = @transform_1, window_bounds = array<i64: 32, 16>}, {pipeline_mode = #tpu.pipeline_mode<synchronous>, transform_indices = @transform_2, window_bounds = array<i64: 32, 1>}, {pipeline_mode = #tpu.pipeline_mode<synchronous>, transform_indices = @transform_3, window_bounds = array<i64: 32, 32>}, {pipeline_mode = #tpu.pipeline_mode<synchronous>, transform_indices = @transform_4, window_bounds = array<i64: 32, 1>}, {pipeline_mode = #tpu.pipeline_mode<synchronous>, transform_indices = @transform_5, window_bounds = array<i64: 32, 32>}, {pipeline_mode = #tpu.pipeline_mode<synchronous>, transform_indices = @transform_6, window_bounds = array<i64: 32, 1>}, {pipeline_mode = #tpu.pipeline_mode<synchronous>, transform_indices = @transform_7, window_bounds = array<i64: 4, 32>}, {pipeline_mode = #tpu.pipeline_mode<synchronous>, transform_indices = @transform_8, window_bounds = array<i64: 4, 1>}, {transform_indices = @transform_9, window_bounds = array<i64: 4, 128>}]} {
    %c0 = arith.constant 0 : index
    %c0_0 = arith.constant 0 : index
    %0 = vector.load %arg1[%c0, %c0_0] : memref<16x128xbf16, #tpu.memory_space<vmem>>, vector<16x128xbf16>
    %c0_1 = arith.constant 0 : index
    %c0_2 = arith.constant 0 : index
    %1 = vector.load %arg2[%c0_1, %c0_2] : memref<32x16xbf16, #tpu.memory_space<vmem>>, vector<32x16xbf16>
    %cst = arith.constant dense<0.000000e+00> : vector<32x128xf32>
    %2 = tpu.matmul %1, %0, %cst {dimension_numbers = #tpu.dot_dimension_numbers<[1], [0], [0], [1], [0, 0, 1, 1], [], []>} : vector<32x16xbf16>, vector<16x128xbf16>, vector<32x128xf32> -> vector<32x128xf32>
    %c0_3 = arith.constant 0 : index
    %c0_4 = arith.constant 0 : index
    %3 = vector.load %arg3[%c0_3, %c0_4] : memref<32x1xf32, #tpu.memory_space<vmem>>, vector<32x1xf32>
    %4 = vector.broadcast %3 : vector<32x1xf32> to vector<32x128xf32>
    %5 = arith.addf %2, %4 : vector<32x128xf32>
    %cst_5 = arith.constant 0.000000e+00 : f32
    %6 = vector.broadcast %cst_5 : f32 to vector<32x128xf32>
    %7 = arith.maximumf %5, %6 : vector<32x128xf32>
    %c0_6 = arith.constant 0 : index
    %c0_7 = arith.constant 0 : index
    %8 = vector.load %arg4[%c0_6, %c0_7] : memref<32x32xbf16, #tpu.memory_space<vmem>>, vector<32x32xbf16>
    %9 = arith.truncf %7 : vector<32x128xf32> to vector<32x128xbf16>
    %cst_8 = arith.constant dense<0.000000e+00> : vector<32x128xf32>
    %10 = tpu.matmul %8, %9, %cst_8 {dimension_numbers = #tpu.dot_dimension_numbers<[1], [0], [0], [1], [0, 0, 1, 1], [], []>} : vector<32x32xbf16>, vector<32x128xbf16>, vector<32x128xf32> -> vector<32x128xf32>
    %c0_9 = arith.constant 0 : index
    %c0_10 = arith.constant 0 : index
    %11 = vector.load %arg5[%c0_9, %c0_10] : memref<32x1xf32, #tpu.memory_space<vmem>>, vector<32x1xf32>
    %12 = vector.broadcast %11 : vector<32x1xf32> to vector<32x128xf32>
    %13 = arith.addf %10, %12 : vector<32x128xf32>
    %cst_11 = arith.constant 0.000000e+00 : f32
    %14 = vector.broadcast %cst_11 : f32 to vector<32x128xf32>
    %15 = arith.maximumf %13, %14 : vector<32x128xf32>
    %c0_12 = arith.constant 0 : index
    %c0_13 = arith.constant 0 : index
    %16 = vector.load %arg6[%c0_12, %c0_13] : memref<32x32xbf16, #tpu.memory_space<vmem>>, vector<32x32xbf16>
    %17 = arith.truncf %15 : vector<32x128xf32> to vector<32x128xbf16>
    %cst_14 = arith.constant dense<0.000000e+00> : vector<32x128xf32>
    %18 = tpu.matmul %16, %17, %cst_14 {dimension_numbers = #tpu.dot_dimension_numbers<[1], [0], [0], [1], [0, 0, 1, 1], [], []>} : vector<32x32xbf16>, vector<32x128xbf16>, vector<32x128xf32> -> vector<32x128xf32>
    %c0_15 = arith.constant 0 : index
    %c0_16 = arith.constant 0 : index
    %19 = vector.load %arg7[%c0_15, %c0_16] : memref<32x1xf32, #tpu.memory_space<vmem>>, vector<32x1xf32>
    %20 = vector.broadcast %19 : vector<32x1xf32> to vector<32x128xf32>
    %21 = arith.addf %18, %20 : vector<32x128xf32>
    %cst_17 = arith.constant 0.000000e+00 : f32
    %22 = vector.broadcast %cst_17 : f32 to vector<32x128xf32>
    %23 = arith.maximumf %21, %22 : vector<32x128xf32>
    %c0_18 = arith.constant 0 : index
    %c0_19 = arith.constant 0 : index
    %24 = vector.load %arg8[%c0_18, %c0_19] : memref<4x32xbf16, #tpu.memory_space<vmem>>, vector<4x32xbf16>
    %25 = arith.truncf %23 : vector<32x128xf32> to vector<32x128xbf16>
    %cst_20 = arith.constant dense<0.000000e+00> : vector<4x128xf32>
    %26 = tpu.matmul %24, %25, %cst_20 {dimension_numbers = #tpu.dot_dimension_numbers<[1], [0], [0], [1], [0, 0, 1, 1], [], []>} : vector<4x32xbf16>, vector<32x128xbf16>, vector<4x128xf32> -> vector<4x128xf32>
    %c0_21 = arith.constant 0 : index
    %c0_22 = arith.constant 0 : index
    %27 = vector.load %arg9[%c0_21, %c0_22] : memref<4x1xf32, #tpu.memory_space<vmem>>, vector<4x1xf32>
    %28 = vector.broadcast %27 : vector<4x1xf32> to vector<4x128xf32>
    %29 = arith.addf %26, %28 : vector<4x128xf32>
    %cst_23 = arith.constant dense<0xFF800000> : vector<128xf32>
    %30 = vector.multi_reduction <maximumf>, %29, %cst_23 [0] : vector<4x128xf32> to vector<128xf32>
    %31 = vector.shape_cast %30 : vector<128xf32> to vector<1x128xf32>
    %32 = vector.broadcast %31 : vector<1x128xf32> to vector<4x128xf32>
    %33 = arith.subf %29, %32 : vector<4x128xf32>
    %34 = math.exp %33 : vector<4x128xf32>
    %cst_24 = arith.constant dense<0.000000e+00> : vector<128xf32>
    %35 = vector.multi_reduction <add>, %34, %cst_24 [0] : vector<4x128xf32> to vector<128xf32>
    %36 = vector.shape_cast %35 : vector<128xf32> to vector<1x128xf32>
    %37 = tpu.reciprocal %36 {approx = true} : vector<1x128xf32> -> vector<1x128xf32>
    %38 = vector.broadcast %37 : vector<1x128xf32> to vector<4x128xf32>
    %39 = arith.mulf %34, %38 : vector<4x128xf32>
    %c0_25 = arith.constant 0 : index
    %c0_26 = arith.constant 0 : index
    %40 = vector.load %arg10[%c0_25, %c0_26] : memref<4x128xf32, #tpu.memory_space<vmem>>, vector<4x128xf32>
    tpu.vector_store %arg10[%c0_25, %c0_26], %39 {strides = array<i32>} : memref<4x128xf32, #tpu.memory_space<vmem>>, vector<4x128xf32>,
    return
  }
  func.func @transform_0(%arg0: i32) -> (i32, i32) {
    %c0_i32 = arith.constant 0 : i32
    %c0_i32_0 = arith.constant 0 : i32
    return %c0_i32, %arg0 : i32, i32
  }
  func.func @transform_1(%arg0: i32) -> (i32, i32) {
    %c0_i32 = arith.constant 0 : i32
    %c0_i32_0 = arith.constant 0 : i32
    %c0_i32_1 = arith.constant 0 : i32
    return %c0_i32, %c0_i32_0 : i32, i32
  }
  func.func @transform_2(%arg0: i32) -> (i32, i32) {
    %c0_i32 = arith.constant 0 : i32
    %c0_i32_0 = arith.constant 0 : i32
    %c0_i32_1 = arith.constant 0 : i32
    return %c0_i32, %c0_i32_0 : i32, i32
  }
  func.func @transform_3(%arg0: i32) -> (i32, i32) {
    %c0_i32 = arith.constant 0 : i32
    %c0_i32_0 = arith.constant 0 : i32
    %c0_i32_1 = arith.constant 0 : i32
    return %c0_i32, %c0_i32_0 : i32, i32
  }
  func.func @transform_4(%arg0: i32) -> (i32, i32) {
    %c0_i32 = arith.constant 0 : i32
    %c0_i32_0 = arith.constant 0 : i32
    %c0_i32_1 = arith.constant 0 : i32
    return %c0_i32, %c0_i32_0 : i32, i32
  }
  func.func @transform_5(%arg0: i32) -> (i32, i32) {
    %c0_i32 = arith.constant 0 : i32
    %c0_i32_0 = arith.constant 0 : i32
    %c0_i32_1 = arith.constant 0 : i32
    return %c0_i32, %c0_i32_0 : i32, i32
  }
  func.func @transform_6(%arg0: i32) -> (i32, i32) {
    %c0_i32 = arith.constant 0 : i32
    %c0_i32_0 = arith.constant 0 : i32
    %c0_i32_1 = arith.constant 0 : i32
    return %c0_i32, %c0_i32_0 : i32, i32
  }
  func.func @transform_7(%arg0: i32) -> (i32, i32) {
    %c0_i32 = arith.constant 0 : i32
    %c0_i32_0 = arith.constant 0 : i32
    %c0_i32_1 = arith.constant 0 : i32
    return %c0_i32, %c0_i32_0 : i32, i32
  }
  func.func @transform_8(%arg0: i32) -> (i32, i32) {
    %c0_i32 = arith.constant 0 : i32
    %c0_i32_0 = arith.constant 0 : i32
    %c0_i32_1 = arith.constant 0 : i32
    return %c0_i32, %c0_i32_0 : i32, i32
  }
  func.func @transform_9(%arg0: i32) -> (i32, i32) {
    %c0_i32 = arith.constant 0 : i32
    %c0_i32_0 = arith.constant 0 : i32
    return %c0_i32, %arg0 : i32, i32
  }
}

</mosaic_0001>

<bundles_post_ra>
// kernel: tpu_custom_call.1
= control target key start
LH: loop header
LB: loop body
LE: loop exit
PB: predicated region body
PF: predicated region fallthrough
CT: control target
= control target key end

     0   :  { %14 = vsyncpa [#allocation4], 0  ;;  %s1256_s0 = inlined_call_operand.vmem [shape: bf16[16,256], index: 0, kind: input, shape index: {}]   ;;  %s1257_s1 = inlined_call_operand.vmem [shape: bf16[32,16], index: 1, kind: input, shape index: {}]   ;;  %s1258_s2 = inlined_call_operand.vmem [shape: f32[32,1], index: 2, kind: input, shape index: {}]   ;;  %s1259_s3 = inlined_call_operand.vmem [shape: bf16[32,32], index: 3, kind: input, shape index: {}]   ;;  %s1260_s4 = inlined_call_operand.vmem [shape: f32[32,1], index: 4, kind: input, shape index: {}]   ;;  %s1261_s5 = inlined_call_operand.vmem [shape: bf16[32,32], index: 5, kind: input, shape index: {}]   ;;  %s1262_s6 = inlined_call_operand.vmem [shape: f32[32,1], index: 6, kind: input, shape index: {}]   ;;  %s1263_s7 = inlined_call_operand.vmem [shape: bf16[4,32], index: 7, kind: input, shape index: {}]   ;;  %s1264_s8 = inlined_call_operand.vmem [shape: f32[4,1], index: 8, kind: input, shape index: {}]   ;;  %s1265_s9 = inlined_call_operand.hbm [shape: f32[4,256], index: 9, kind: output, shape index: {}]  }
   0x1   :  { %16 = vsyncpa [#allocation4 + $0x1], 0  ;;  %s1077_s30 = smov 0   ;;  %s1079_s10 = smov 0  }
   0x2   :  { %s1081_s11 = smov 0   ;;  %s1083_s12 = smov 0  }
   0x3 LB: > { %s833_s13 = sadd.s32 4294967295, %s1021_s12   ;;  %s834_s14 = sadd.s32 4294967294, %s1021_s12   ;;  %s1021_s12 = sphi %s1083_s12, %s1271_s12   ;;  %s1017_s11 = sphi %s1081_s11, %s1270_s11   ;;  %s1013_s10 = sphi %s1079_s10, %s1269_s10   ;;  %s1009_s30 = sphi %s1077_s30, %s1268_s30  }
   0x4   : > { %s1100_s15 = sadd.s32 1, %s1021_s12   ;;  %s29_s16 = sadd.s32 1, %s1017_s11 }
   0x5   : > { %s26_s17 = ssub.s32 %s1021_s12, %s1100_s15  ;;  %p36_p0 = scmp.ne.s32.totalorder %s1017_s11, %s1013_s10 }
   0x6   : > { %p27_p1 = scmp.eq.s32.totalorder %s26_s17, 0  ;;  %p37_p2 = scmp.eq.s32.totalorder %s1021_s12, 0 }
   0x7   : > { %p234_p3 = scmp.eq.s32.totalorder %s833_s13, 1  ;;  %p239_p4 = scmp.ne.s32.totalorder %s1013_s10, %s1009_s30 }
   0x8   : > { %s1113_s18 = scalar_select %p27_p1, %s1017_s11, %s29_s16  }
   0x9   : > { %p38_p5 = por %p37_p2, %p36_p0  ;;  %p1115_p6 = por %p234_p3, %p36_p0 }
   0xa   : > { %p240_p7 = scmp.eq.s32.totalorder %s834_s14, 1  ;;  %p836_p9 = scmp.ge.s32.totalorder %s1021_s12, 2 }
   0xc   : > { %p1119_p8 = por %p240_p7, %p239_p4  ;;  %280 = sbr.rel (%p836_p9) target bundleno = 26 (0x1a), region = 48 }
  0x13   : > { %283 = sbr.rel (!%p38_p5) target bundleno = 26 (0x1a), region = 52  ;;  %s285_s21 = sand.u32 (%p38_p5), 1, %s1017_s11  }
  0x14   : > { %s838_s22 = sshll.u32 (%p38_p5), %s1021_s12, 2  ;;  %s837_s23 = sshll.u32 (%p38_p5), %s285_s21, 3 }
  0x15   : > { %s289_s26 = scalar_lea.vmem (%p38_p5), %s1256_s0, %s838_s22  ;;  %s287_s27 = scalar_lea.vmem (%p38_p5), [#allocation2], %s837_s23 }
  0x16   : > { %v305_v0 = vld [vmem:[%s289_s26] sm:$0xf] (%p38_p5)  ;;  %v307_v1 = vld [vmem:[%s289_s26 + $0x8] sm:$0xf] (%p38_p5) }
  0x17   : > { %306 = vst [vmem:[%s287_s27] sm:$0xf] (%p38_p5), %v305_v0  ;;  %308 = vst [vmem:[%s287_s27 + $0x4] sm:$0xf] (%p38_p5), %v307_v1 }
  0x1a PF: > { %p839_p10 = scmp.ge.s32.totalorder %s1021_s12, 1  ;;  %p334_p11 = scmp.lt.s32.totalorder %s1021_s12, 3 }
  0x1c   : > { %p335_p12 = pnand %p839_p10, %p334_p11 }
  0x1d   : > { %s1134_s28 = sand.u32 (!%p335_p12), 1, %s1013_s10   ;;  %v949_v2 = vld [vmem:[%s1257_s1] sm:$0xff] (!%p335_p12)   ;;  %vm423_vm0 = vcmask (!%p335_p12), 130048   ;;  %v1023_v5 = vmov (!%p335_p12), 0   ;;  %v385_v6 = vld [vmem:[%s1258_s2 + $0x10] sm:$0xff] (!%p335_p12)  ;;  %v950_v7 = vld [vmem:[%s1257_s1 + $0x8] sm:$0xff] (!%p335_p12)  }
  0x1e   : > { %338 = sbr.rel (%p335_p12) target bundleno = 1005 (0x3ed), region = 93  ;;  %s840_s16 = sshll.u32 (!%p335_p12), %s1134_s28, 3  ;;  %876 = vmatprep.mubr.msk.bf16.mxu0 (!%p335_p12), %vm423_vm0, %v949_v2  ;;  %v383_v3 = vld [vmem:[%s1258_s2] sm:$0xff] (!%p335_p12)  ;;  %946 = vset.pattern.permute.xlu0 (!%p335_p12), %v1023_v5  ;;  %v384_v8 = vld [vmem:[%s1258_s2 + $0x8] sm:$0xff] (!%p335_p12)  ;;  %v386_v9 = vld [vmem:[%s1258_s2 + $0x18] sm:$0xff] (!%p335_p12)  ;;  %vm523_vm1 = vcmask (!%p335_p12), 261120  }
  0x1f   : > { %s343_s22 = scalar_lea.vmem (!%p335_p12), [#allocation2], %s840_s16  ;;  %947 = vset.pattern.permute.xlu1 (!%p335_p12), %v1023_v5  ;;  %389 = vperm.xlu0 (!%p335_p12), %946, %v383_v3   ;;  %v489_v10 = vld [vmem:[%s1260_s4] sm:$0xff] (!%p335_p12)  ;;  %v490_v11 = vld [vmem:[%s1260_s4 + $0x8] sm:$0xff] (!%p335_p12)  ;;  %v491_v12 = vld [vmem:[%s1260_s4 + $0x10] sm:$0xff] (!%p335_p12)  ;;  %v1024_v59 = vmov (!%p335_p12), 0.0   ;;  %vm1025_vm2 = vmmov (!%p335_p12), 0  }
  0x20   : > { %v948_v4 = vld [vmem:[%s343_s22] sm:$0xff] (!%p335_p12)   ;;  %399 = vperm.xlu1 (!%p335_p12), %947, %v385_v6   ;;  %v492_v13 = vld [vmem:[%s1260_s4 + $0x18] sm:$0xff] (!%p335_p12)  ;;  %v591_v16 = vld [vmem:[%s1262_s6 + $0x10] sm:$0xff] (!%p335_p12)  ;;  %vm734_vm3 = vcmask (!%p335_p12), 1043456   ;;  %s841_s26 = sshll.u32 (!%p335_p12), %s1134_s28, 2  ;;  %s857_s27 = sshll.u32 (!%p335_p12), %s833_s13, 6 }
  0x21   : > { %874 = vmatprep.subr.bf16.mxu0 (!%p335_p12), %v948_v4  ;;  %v589_v14 = vld [vmem:[%s1262_s6] sm:$0xff] (!%p335_p12)  ;;  %v590_v15 = vld [vmem:[%s1262_s6 + $0x8] sm:$0xff] (!%p335_p12)  ;;  %v592_v17 = vld [vmem:[%s1262_s6 + $0x18] sm:$0xff] (!%p335_p12)  ;;  %s375_s29 = scalar_lea.vmem (!%p335_p12), [#allocation3], %s841_s26  ;;  %s1212_s21 = scalar_lea.hbm (!%p335_p12), %s1265_s9, %s857_s27 }
  0x22   : > { %875 = vmatpush3.bf16.msra.mxu0 (!%p335_p12), %v948_v4  ;;  %v685_v18 = vld [vmem:[%s1264_s8] sm:$0xf] (!%p335_p12)  ;;  %v952_v38 = vld [vmem:[%s1259_s3 + $0x8] sm:$0xff] (!%p335_p12)   ;;  %s769_s14 = sshll.u32 (!%p335_p12), %s375_s29, 4  ;;  %s756_s22 = scalar_lea.sflag (!%p335_p12), [#allocation4], %s1134_s28  ;;  %s1214_s14 = int_to_ptr.vmem [resolvable:$true] %s769_s14 }
  0x23   : > { %394 = vperm.xlu0 (!%p335_p12), %946, %v384_v8   ;;  %v951_v19 = vld [vmem:[%s1259_s3] sm:$0xff] (!%p335_p12)   ;;  %v954_v58 = vld [vmem:[%s1261_s5 + $0x8] sm:$0xff] (!%p335_p12)   ;;  %s959_s23 = scalar_lea.vmem (!%p335_p12), %s1214_s14, 64  ;;  %s1026_s13 = smov (!%p335_p12), [#allocation3]  }
  0x24   : > { %404 = vperm.xlu1 (!%p335_p12), %947, %v386_v9   ;;  %884 = vmatprep.mubr.msk.bf16.mxu1 (!%p335_p12), %vm523_vm1, %v951_v19  ;;  %v953_v39 = vld [vmem:[%s1261_s5] sm:$0xff] (!%p335_p12)   ;;  %p960_p13 = scmp.ne.s32.totalorder (!%p335_p12), %s1214_s14, %s959_s23  ;;  %s963_s24 = sshll.u32 (!%p335_p12), %s1026_s13, 4  ;;  %s964_s24 = int_to_ptr.vmem [resolvable:$false] %s963_s24 }
  0x25   : > { %877 = vmatmul.mubr.msk.bf16.vlgmr.msra.gmra.mrb[0].mxu0 %vm423_vm0, %v950_v7  ;;  %s965_s25 = scalar_lea.vmem %s964_s24, 128  ;;  %p966_p2 = scmp.lt.s32.totalorder %s1214_s14, %s964_s24 }
  0x26   : > { %892 = vmatprep.mubr.msk.bf16.mxu0 %vm523_vm1, %v953_v39  ;;  %p961_p0 = pnand %p960_p13, %p1115_p6  ;;  %p967_p3 = scmp.lt.s32.totalorder %s965_s25, %s959_s23 }
  0x27   : > { %495 = vperm.xlu0 %946, %v489_v10  }
  0x28   : > { %500 = vperm.xlu1 %947, %v490_v11   ;;  %p962_p1 = pneg %p961_p0  ;;  %p968_p4 = por %p967_p3, %p966_p2 }
  0x2a   : > { %p969_p5 = pnand %p968_p4, %p962_p1 }
  0x2b   : > { %505 = vperm.xlu0 %946, %v491_v12  }
  0x2c   : > { %510 = vperm.xlu1 %947, %v492_v13  }
  0x2f   : > { %595 = vperm.xlu0 %946, %v589_v14   ;;  %v682_v14 = vld [vmem:[%s1263_s7] sm:$0x3] }
  0x30   : > { %600 = vperm.xlu1 %947, %v590_v15  }
  0x33   : > { %605 = vperm.xlu0 %946, %v591_v16  }
  0x34   : > { %610 = vperm.xlu1 %947, %v592_v17  }
  0x37   : > { %688 = vperm.xlu0 %946, %v685_v18  }
  0x9e   : > { %v390_v21 = vpop.permute.xlu0 %389 }
  0x9f   : > { %v400_v20 = vpop.permute.xlu1 %399 }
  0xa2   : > { %v395_v28 = vpop.permute.xlu0 %394 }
  0xa3   : > { %v405_v25 = vpop.permute.xlu1 %404 }
  0xa6   : > { %v496_v40 = vpop.permute.xlu0 %495 }
  0xa7   : > { %v501_v41 = vpop.permute.xlu1 %500 }
  0xaa   : > { %v506_v42 = vpop.permute.xlu0 %505 }
  0xab   : > { %v511_v46 = vpop.permute.xlu1 %510 }
  0xae   : > { %v596_v60 = vpop.permute.xlu0 %595 }
  0xaf   : > { %v601_v61 = vpop.permute.xlu1 %600 }
  0xb2   : > { %v606_v62 = vpop.permute.xlu0 %605 }
  0xb3   : > { %v611_v2 = vpop.permute.xlu1 %610 }
  0xb6   : > { %v689_v15 = vpop.permute.xlu0 %688 }
  0xf8   : > { %v878_v22 = vpop.f32.mrb[0].mxu0 }
  0xf9   : > { %v473_v23 = vadd.f32 %v878_v22, %v400_v20  ;;  %v464_v24 = vpop.f32.mrb[1].mxu0 }
  0xfa   : > { %v465_v26 = vadd.f32 %v464_v24, %v390_v21  ;;  %v879_v27 = vpop.f32.mrb[2].mxu0 }
  0xfb   : > { %v476_v29 = vadd.f32 %v879_v27, %v405_v25  ;;  %v467_v30 = vpop.f32.mrb[3].mxu0  ;;  %v481_v32 = vmax.f32 %v473_v23, 0.0 }
  0xfc   : > { %v468_v31 = vadd.f32 %v467_v30, %v395_v28  ;;  %v479_v34 = vmax.f32 %v465_v26, 0.0 }
  0xfd   : > { %v482_v33 = vmax.f32 %v476_v29, 0.0 }
  0xfe   : > { %v480_v35 = vmax.f32 %v468_v31, 0.0 }
  0xff   : > { %v488_v36 = vpack.c.bf16 %v482_v33, %v481_v32 }
 0x100   : > { %v487_v37 = vpack.c.bf16 %v480_v35, %v479_v34 }
 0x102   : > { %880 = vmatprep.subr.bf16.mxu1 %v487_v37 }
 0x103   : > { %881 = vmatpush3.bf16.msra.mxu1 %v487_v37 }
 0x104   : > { %882 = vmatprep.subr.bf16.mxu1 %v488_v36 }
 0x107   : > { %883 = vmatpush3.bf16.msra.mxu1 %v488_v36 }
 0x108   : > { %896 = vmatprep.subr.bf16.mxu1 %v1024_v59 }
 0x10a   : > { %885 = vmatmul.mubr.msk.bf16.vlgmr.msra.gmra.mrb[0].mxu1 %vm523_vm1, %v952_v38 }
 0x10b   : > { %900 = vmatprep.mubr.msk.bf16.mxu1 %vm1025_vm2, %v1024_v59 }
 0x1dd   : > { %v886_v43 = vpop.f32.mrb[0].mxu1 }
 0x1de   : > { %v573_v44 = vadd.f32 %v886_v43, %v506_v42  ;;  %v564_v45 = vpop.f32.mrb[1].mxu1 }
 0x1df   : > { %v565_v47 = vadd.f32 %v564_v45, %v496_v40  ;;  %v887_v48 = vpop.f32.mrb[2].mxu1 }
 0x1e0   : > { %v576_v49 = vadd.f32 %v887_v48, %v511_v46  ;;  %v567_v50 = vpop.f32.mrb[3].mxu1  ;;  %v581_v52 = vmax.f32 %v573_v44, 0.0 }
 0x1e1   : > { %v568_v51 = vadd.f32 %v567_v50, %v501_v41  ;;  %v579_v54 = vmax.f32 %v565_v47, 0.0 }
 0x1e2   : > { %v582_v53 = vmax.f32 %v576_v49, 0.0 }
 0x1e3   : > { %v580_v55 = vmax.f32 %v568_v51, 0.0 }
 0x1e4   : > { %v588_v56 = vpack.c.bf16 %v582_v53, %v581_v52 }
 0x1e5   : > { %v587_v57 = vpack.c.bf16 %v580_v55, %v579_v54 }
 0x1e7   : > { %888 = vmatprep.subr.bf16.mxu0 %v587_v57 }
 0x1e8   : > { %889 = vmatpush3.bf16.msra.mxu0 %v587_v57 }
 0x1e9   : > { %890 = vmatprep.subr.bf16.mxu0 %v588_v56 }
 0x1ec   : > { %891 = vmatpush3.bf16.msra.mxu0 %v588_v56 }
 0x1ef   : > { %893 = vmatmul.mubr.msk.bf16.vlgmr.msra.gmra.mrb[4].mxu0 %vm523_vm1, %v954_v58 }
 0x2c2   : > { %v894_v63 = vpop.f32.mrb[4].mxu0 }
 0x2c3   : > { %v672_v0 = vadd.f32 %v894_v63, %v606_v62  ;;  %v663_v1 = vpop.f32.mrb[5].mxu0 }
 0x2c4   : > { %v664_v3 = vadd.f32 %v663_v1, %v596_v60  ;;  %v895_v4 = vpop.f32.mrb[6].mxu0 }
 0x2c5   : > { %v675_v5 = vadd.f32 %v895_v4, %v611_v2  ;;  %v666_v6 = vpop.f32.mrb[7].mxu0  ;;  %v680_v8 = vmax.f32 %v672_v0, 0.0 }
 0x2c6   : > { %v667_v7 = vadd.f32 %v666_v6, %v601_v61  ;;  %v678_v10 = vmax.f32 %v664_v3, 0.0 }
 0x2c7   : > { %v681_v9 = vmax.f32 %v675_v5, 0.0 }
 0x2c8   : > { %v679_v11 = vmax.f32 %v667_v7, 0.0 }
 0x2c9   : > { %v684_v12 = vpack.c.bf16 %v681_v9, %v680_v8 }
 0x2ca   : > { %v683_v13 = vpack.c.bf16 %v679_v11, %v678_v10 }
 0x2cc   : > { %897 = vmatpush3.bf16.msra.mxu1 %v683_v13 }
 0x2cd   : > { %898 = vmatprep.subr.bf16.mxu1 %v1024_v59 }
 0x2d0   : > { %899 = vmatpush3.bf16.msra.mxu1 %v684_v12 }
 0x2d3   : > { %901 = vmatmul.mubr.msk.bf16.vlgmr.msra.gmra.mrb[4].mxu1 %vm523_vm1, %v682_v14 }
 0x3a6   : > { %v728_v16 = vpop.f32.mrb[4].mxu1 }
 0x3a7   : > { %v729_v17 = vadd.f32 %v728_v16, %v689_v15  ;;  %v902_v18 = vpop.f32.mrb[5].mxu1 }
 0x3a8   : > { %v731_v19 = vpop.f32.mrb[6].mxu1 }
 0x3a9   : > { %v735_v20 = vsel %vm734_vm3, %v729_v17, -inf  ;;  %v903_v21 = vpop.f32.mrb[7].mxu1 }
 0x3aa   : > { %v736_v22 = vrot.slane %v735_v20, 4 }
 0x3ac   : > { %v737_v23 = vmax.f32 %v735_v20, %v736_v22 }
 0x3ae   : > { %v738_v24 = vrot.slane %v737_v23, 2 }
 0x3b0   : > { %v739_v25 = vmax.f32 %v737_v23, %v738_v24 }
 0x3b2   : > { %v740_v26 = vrot.slane %v739_v25, 1 }
 0x3b4   : > { %v741_v27 = vmax.f32 %v739_v25, %v740_v26 }
 0x3b6   : > { %v742_v28 = vsub.f32 %v729_v17, %v741_v27 }
 0x3b8   : > { %v743_v29 = vmul.f32 1.442695, %v742_v28 }
 0x3ba   : > { %955 = vpow2.f32 %v743_v29 }
 0x3c4   : > { %v956_v30 = vpop.eup %955 }
 0x3c5   : > { %v745_v31 = vsel %vm734_vm3, %v956_v30, 0.0 }
 0x3c6   : > { %v746_v32 = vrot.slane %v745_v31, 4 }
 0x3c8   : > { %v747_v33 = vadd.f32 %v746_v32, %v745_v31 }
 0x3ca   : > { %v748_v34 = vrot.slane %v747_v33, 2 }
 0x3cc   : > { %v749_v35 = vadd.f32 %v748_v34, %v747_v33 }
 0x3ce   : > { %v750_v36 = vrot.slane %v749_v35, 1 }
 0x3d0   : > { %v751_v37 = vadd.f32 %v750_v36, %v749_v35 }
 0x3d2   : > { %957 = vrcp.f32 %v751_v37 }
 0x3dc   : > { %v958_v38 = vpop.eup %957 }
 0x3dd   : > { %v753_v39 = vmul.f32 %v958_v38, %v956_v30 }
 0x3df   : > { %754 = vst [vmem:[%s375_s29] sm:$0xf] %v753_v39 }
 0x3e0   : > { %972 = shalt.err (!%p969_p5)
}
 0x3e1   : > { %s973_s28 = scalar_lea.hbm %s1212_s21, 64  ;;  %s977_s29 = scalar_lea.hbm %s1265_s9, 128 }
 0x3e2   : > { %p974_p7 = scmp.ne.s32.totalorder %s1212_s21, %s973_s28  ;;  %p978_p12 = scmp.lt.u32.totalorder %s1212_s21, %s1265_s9 }
 0x3e3   : > { %p979_p13 = scmp.lt.u32.totalorder %s977_s29, %s973_s28  ;;  %p981_p1 = scmp.lt.u32.totalorder %s973_s28, %s1212_s21 }
 0x3e4   : > { %p975_p10 = pnand %p974_p7, %p1115_p6 }
 0x3e5   : > { %p980_p0 = por %p979_p13, %p978_p12 }
 0x3e6   : > { %p976_p11 = pneg %p975_p10 }
 0x3e7   : > { %p982_p2 = por %p981_p1, %p980_p0 }
 0x3e9   : > { %p983_p3 = pnand %p982_p2, %p976_p11 }
 0x3eb   : > { %986 = shalt.err (!%p983_p3)
}
 0x3ec   : > { %904 = dma.vmem_to_hbm [thread:$0]  (%p1115_p6), %s1214_s14, 64, %s1212_s21, %s756_s22  }
 0x3ed PF: > { %s781_s23 = sand.u32 1, %s1009_s30   ;;  %p907_p4 = pnand %p836_p9, %p1119_p8 }
 0x3ee   : > { %s782_s13 = scalar_lea.sflag [#allocation4], %s781_s23 }
 0x3ef   : > { %1004 = dma.done.wait (!%p907_p4), %s782_s13, 64  }
 0x3f0   : > { %1006 = vsyncadd (!%p907_p4), %s782_s13, 4294967232  ;;  %p19_p5 = scmp.ge.s32.totalorder %s1100_s15, 4   ;;  %s1268_s30 = smov %s1013_s10 }
 0x3f1   : > { %s1269_s10 = smov %s1017_s11  ;;  %s1270_s11 = smov %s1113_s18 }
 0x3f2   : > { %s1271_s12 = smov %s1100_s15  ;;  %21 = sbr.rel (!%p19_p5) target bundleno = 3 (0x3), region = 137 }
 0x3f9   :  { %787 = vsyncpa [#allocation4], 1 }
 0x3fa   :  { %789 = vsyncpa [#allocation4 + $0x1], 1 }

</bundles_post_ra>
